<compile_context>
chip_gen: v7x
topology: tpu7x:2x2x1
jax: 0.10.0
libtpu: 0.0.40
codegen_flags: <defaults>
</compile_context>

<pallas_src>
import functools
import math

import jax
import jax.numpy as jnp
from jax.experimental import pallas as pl
from jax.experimental.pallas import tpu as pltpu

_MIB = 1 << 20


def make_positional_encoding(d_model: int, max_len: int) -> jnp.ndarray:
    """Sinusoidal table, same math as the torch __init__. Shape (max_len, d_model)."""
    position = jnp.arange(0, max_len, dtype=jnp.float32)[:, None]                  # (L, 1)
    div_term = jnp.exp(
        jnp.arange(0, d_model, 2, dtype=jnp.float32) * (-(math.log(10000.0) / d_model))
    )                                                                               # (D/2,)
    angles = position * div_term                                                    # (L, D/2)
    pe = jnp.zeros((max_len, d_model), dtype=jnp.float32)
    pe = pe.at[:, 0::2].set(jnp.sin(angles))
    pe = pe.at[:, 1::2].set(jnp.cos(angles))
    return pe


def _target_block_bytes() -> int:
    """Per-generation x/out block-size target (HBM roofline vs VMEM budget)."""
    try:
        kind = jax.devices()[0].device_kind.lower()
    except Exception:
        return 4 * _MIB
    if "v5" in kind:
        return 3 * _MIB   # v5e: ~0.8 TB/s HBM, small scoped-VMEM default
    if "v6" in kind:
        return 6 * _MIB   # v6e: 1.4 TB/s HBM, 128 MiB physical VMEM
    if "v7" in kind:
        return 5 * _MIB   # v7x: 3.2 TB/s HBM but only 64 MiB VMEM per TC
    return 4 * _MIB


def _choose_tile_s(seq_len: int, row_bytes: int, target_bytes: int) -> int:
    """Largest multiple-of-8 sequence tile near target_bytes, keeping >=4 grid steps."""
    if seq_len <= 8:
        return seq_len                           # full-dim block satisfies the (8,128) rule
    t = int(target_bytes // max(row_bytes, 1))
    t -= t % 8
    t = max(8, t)
    quarter = (seq_len // 4) - (seq_len // 4) % 8
    if quarter >= 8:                             # keep pipelining / megacore sharding busy
        t = min(t, quarter)
    t = min(t, ((seq_len + 7) // 8) * 8)         # never bigger than the padded sequence
    return t


def _pe_add_kernel_lanedense(x_ref, pe_ref, o_ref, pe_wide_ref, *, batch: int, d_model: int):
    # x_ref / o_ref: (tile_s, B*D);  pe_ref: (tile_s, D);  pe_wide_ref: VMEM (tile_s, B*D).
    # Column b*D + d of the flattened x corresponds to pe[:, d], so replicate the pe
    # block B times along the lane axis (into VMEM scratch), then do one full-lane add.
    pe = pe_ref[...].astype(o_ref.dtype)
    for b in range(batch):                       # static, small unroll; VMEM-local stores
        pe_wide_ref[:, b * d_model:(b + 1) * d_model] = pe
    o_ref[...] = x_ref[...].astype(o_ref.dtype) + pe_wide_ref[...]


def _pe_add_kernel_3d(x_ref, pe_ref, o_ref):
    # x_ref / o_ref: (tile_s, B, D);  pe_ref: (tile_s, D) broadcast over the batch axis.
    o_ref[...] = x_ref[...].astype(o_ref.dtype) + pe_ref[...][:, None, :].astype(o_ref.dtype)


def positional_encoding_forward(
    x: jnp.ndarray,
    pe: jnp.ndarray,
    *,
    force_pallas: bool = False,
    min_pallas_bytes: int = 1 * _MIB,
) -> jnp.ndarray:
    """x: (S, B, D);  pe: (max_len, D).  Returns x + pe[:S] broadcast over batch."""
    S, B, D = x.shape
    pe_s = pe[:S]                                               # mirrors pe[:x.size(0), :]
    out_dtype = jnp.promote_types(x.dtype, pe.dtype)            # matches torch's x + pe promotion

    x_bytes = x.size * jnp.dtype(x.dtype).itemsize
    if not force_pallas and x_bytes < min_pallas_bytes:
        # Tiny activations: pallas_call fixed per-step cost dominates; let XLA fuse the add.
        return x + pe_s[:, None, :]

    itemsize = max(jnp.dtype(x.dtype).itemsize, jnp.dtype(out_dtype).itemsize)
    tile_s = _choose_tile_s(S, B * D * itemsize, _target_block_bytes())
    grid = (pl.cdiv(S, tile_s),)                                # ragged tail handled by Pallas

    # In-place on x's HBM buffer whenever the output dtype matches the input dtype.
    aliases = {0: 0} if out_dtype == x.dtype else {}

    compiler_params = pltpu.CompilerParams(
        dimension_semantics=("parallel",),        # shard the grid across TCs (v7x megacore)
        vmem_limit_bytes=48 * _MIB,               # > v5e's 16 MiB default, < v7x's 64 MiB physical
    )

    if D < 128:
        # Lane-dense path: view x as (S, B*D) (free row-major flatten) so the hot
        # stores are full-lane instead of masked partial stores on a D<128 minor dim.
        bd = B * D
        x2 = x.reshape(S, bd)
        out2 = pl.pallas_call(
            functools.partial(_pe_add_kernel_lanedense, batch=B, d_model=D),
            out_shape=jax.ShapeDtypeStruct((S, bd), out_dtype),
            grid_spec=pltpu.PrefetchScalarGridSpec(
                num_scalar_prefetch=0,
                grid=grid,
                in_specs=[
                    pl.BlockSpec((tile_s, bd), lambda i: (i, 0)),
                    pl.BlockSpec((tile_s, D), lambda i: (i, 0)),
                ],
                out_specs=pl.BlockSpec((tile_s, bd), lambda i: (i, 0)),
                scratch_shapes=[pltpu.VMEM((tile_s, bd), out_dtype)],
            ),
            compiler_params=compiler_params,
            input_output_aliases=aliases,
        )(x2, pe_s)
        return out2.reshape(S, B, D)

    # D >= 128: minor dim is already lane-dense; keep the (S, B, D) layout.
    return pl.pallas_call(
        _pe_add_kernel_3d,
        out_shape=jax.ShapeDtypeStruct((S, B, D), out_dtype),
        grid_spec=pltpu.PrefetchScalarGridSpec(
            num_scalar_prefetch=0,
            grid=grid,
            in_specs=[
                pl.BlockSpec((tile_s, B, D), lambda i: (i, 0, 0)),
                pl.BlockSpec((tile_s, D), lambda i: (i, 0)),
            ],
            out_specs=pl.BlockSpec((tile_s, B, D), lambda i: (i, 0, 0)),
        ),
        compiler_params=compiler_params,
        input_output_aliases=aliases,
    )(x, pe_s)


if __name__ == "__main__":
    key = jax.random.PRNGKey(0)

    # Case 1: d_model < 128 -> lane-dense (S, B*D) kernel path.
    d_model, max_len, S, B = 32, 128, 64, 2
    pe = make_positional_encoding(d_model, max_len)
    x = jax.random.normal(key, (S, B, d_model), dtype=jnp.float32)
    ref = x + pe[:S][:, None, :]
    out = jax.block_until_ready(positional_encoding_forward(x, pe, force_pallas=True))
    assert out.shape == (S, B, d_model) and out.dtype == ref.dtype
    assert jnp.allclose(out, ref, atol=1e-6, rtol=1e-6)

    # Case 2: d_model >= 128 -> (S, B, D) kernel path.
    d_model2, max_len2, S2, B2 = 128, 64, 32, 2
    pe2 = make_positional_encoding(d_model2, max_len2)
    x_b = jax.random.normal(jax.random.fold_in(key, 1), (S2, B2, d_model2), dtype=jnp.float32)
    ref2 = x_b + pe2[:S2][:, None, :]
    out2 = jax.block_until_ready(positional_encoding_forward(x_b, pe2, force_pallas=True))
    assert jnp.allclose(out2, ref2, atol=1e-6, rtol=1e-6)

    # Case 3: tiny-shape bypass (plain fused XLA add), same semantics.
    x_c = jax.random.normal(jax.random.fold_in(key, 2), (8, 2, d_model), dtype=jnp.float32)
    out3 = jax.block_until_ready(positional_encoding_forward(x_c, pe))
    assert jnp.allclose(out3, x_c + pe[:8][:, None, :], atol=1e-6, rtol=1e-6)

    print("KERNEL_OK")
</pallas_src>

<mosaic_0001>
module attributes {stable_mosaic.version = 11 : i64} {
  func.func @_pe_add_kernel_lanedense(%arg0: i32, %arg1: memref<16x64xf32, #tpu.memory_space<vmem>>, %arg2: memref<16x32xf32, #tpu.memory_space<vmem>>, %arg3: memref<16x64xf32, #tpu.memory_space<vmem>>, %arg4: memref<16x64xf32, #tpu.memory_space<vmem>>) attributes {dimension_semantics = [#tpu.dimension_semantics<parallel>], iteration_bounds = array<i64: 4>, scalar_prefetch = 0 : i64, scratch_operands = 1 : i64, tpu.core_type = #tpu.core_type<tc>, window_params = [{transform_indices = @transform_0, window_bounds = array<i64: 16, 64>}, {transform_indices = @transform_1, window_bounds = array<i64: 16, 32>}, {transform_indices = @transform_2, window_bounds = array<i64: 16, 64>}]} {
    %c0 = arith.constant 0 : index
    %c0_0 = arith.constant 0 : index
    %0 = vector.load %arg2[%c0, %c0_0] : memref<16x32xf32, #tpu.memory_space<vmem>>, vector<16x32xf32>
    %c0_1 = arith.constant 0 : index
    %c0_2 = arith.constant 0 : index
    %1 = vector.load %arg4[%c0_1, %c0_2] : memref<16x64xf32, #tpu.memory_space<vmem>>, vector<16x32xf32>
    tpu.vector_store %arg4[%c0_1, %c0_2], %0 {strides = array<i32>} : memref<16x64xf32, #tpu.memory_space<vmem>>, vector<16x32xf32>,
    %c0_3 = arith.constant 0 : index
    %c32 = arith.constant 32 : index
    %2 = vector.load %arg4[%c0_3, %c32] : memref<16x64xf32, #tpu.memory_space<vmem>>, vector<16x32xf32>
    tpu.vector_store %arg4[%c0_3, %c32], %0 {strides = array<i32>} : memref<16x64xf32, #tpu.memory_space<vmem>>, vector<16x32xf32>,
    %c0_4 = arith.constant 0 : index
    %c0_5 = arith.constant 0 : index
    %3 = vector.load %arg1[%c0_4, %c0_5] : memref<16x64xf32, #tpu.memory_space<vmem>>, vector<16x64xf32>
    %c0_6 = arith.constant 0 : index
    %c0_7 = arith.constant 0 : index
    %4 = vector.load %arg4[%c0_6, %c0_7] : memref<16x64xf32, #tpu.memory_space<vmem>>, vector<16x64xf32>
    %5 = arith.addf %3, %4 : vector<16x64xf32>
    %c0_8 = arith.constant 0 : index
    %c0_9 = arith.constant 0 : index
    %6 = vector.load %arg3[%c0_8, %c0_9] : memref<16x64xf32, #tpu.memory_space<vmem>>, vector<16x64xf32>
    tpu.vector_store %arg3[%c0_8, %c0_9], %5 {strides = array<i32>} : memref<16x64xf32, #tpu.memory_space<vmem>>, vector<16x64xf32>,
    return
  }
  func.func @transform_0(%arg0: i32) -> (i32, i32) {
    %c0_i32 = arith.constant 0 : i32
    %c0_i32_0 = arith.constant 0 : i32
    return %arg0, %c0_i32 : i32, i32
  }
  func.func @transform_1(%arg0: i32) -> (i32, i32) {
    %c0_i32 = arith.constant 0 : i32
    %c0_i32_0 = arith.constant 0 : i32
    return %arg0, %c0_i32 : i32, i32
  }
  func.func @transform_2(%arg0: i32) -> (i32, i32) {
    %c0_i32 = arith.constant 0 : i32
    %c0_i32_0 = arith.constant 0 : i32
    return %arg0, %c0_i32 : i32, i32
  }
}

</mosaic_0001>

<bundles_post_ra>
// kernel: tpu_custom_call.1
= control target key start
LH: loop header
LB: loop body
LE: loop exit
PB: predicated region body
PF: predicated region fallthrough
CT: control target
= control target key end

     0   :  { %7 = vsyncpa [#allocation4], 0  ;;  %s663_s0 = inlined_call_operand.hbm [shape: f32[64,64], index: 0, kind: input, shape index: {}, may-alias: {0,2}]   ;;  %s664_s1 = inlined_call_operand.vmem [shape: f32[64,32], index: 1, kind: input, shape index: {}]   ;;  %s665_s2 = inlined_call_operand.hbm [shape: f32[64,64], index: 2, kind: output, shape index: {}, may-alias: {0,2}]  }
   0x1   :  { %9 = vsyncpa [#allocation4 + $0x1], 0 }
   0x2   :  { %10 = vsyncpa [#allocation5], 0 }
   0x3   :  { %12 = vsyncpa [#allocation5 + $0x1], 0  ;;  %s499_s9 = smov 0   ;;  %s501_s10 = smov 0  }
   0x4   :  { %s503_s11 = smov 0   ;;  %s505_s12 = smov 0  }
   0x5 LB: > { %s520_s13 = sadd.s32 4294967295, %s475_s12   ;;  %s310_s14 = sadd.s32 4294967294, %s475_s12   ;;  %s475_s12 = sphi %s505_s12, %s677_s12   ;;  %s471_s11 = sphi %s503_s11, %s676_s11   ;;  %s467_s10 = sphi %s501_s10, %s675_s10   ;;  %s463_s9 = sphi %s499_s9, %s674_s9  }
   0x6   : > { %s524_s15 = sadd.s32 1, %s475_s12   ;;  %s25_s16 = sadd.s32 1, %s471_s11 }
   0x7   : > { %s22_s17 = ssub.s32 %s475_s12, %s524_s15  ;;  %p32_p0 = scmp.ne.s32.totalorder %s471_s11, %s467_s10 }
   0x8   : > { %p23_p1 = scmp.eq.s32.totalorder %s22_s17, 0  ;;  %p33_p2 = scmp.eq.s32.totalorder %s475_s12, 0 }
   0x9   : > { %p38_p3 = scmp.ne.s32.totalorder %s467_s10, %s463_s9  ;;  %p39_p4 = scmp.eq.s32.totalorder %s520_s13, 0 }
   0xa   : > { %s536_s18 = scalar_select %p23_p1, %s471_s11, %s25_s16  }
   0xb   : > { %p538_p5 = por %p33_p2, %p32_p0  ;;  %p542_p6 = por %p39_p4, %p38_p3 }
   0xc   : > { %p88_p7 = scmp.eq.s32.totalorder %s520_s13, 3  ;;  %p94_p8 = scmp.eq.s32.totalorder %s310_s14, 3 }
   0xd   : > { %p340_p9 = scmp.lt.s32.totalorder %s475_s12, 4  ;;  %s114_s23 = sand.u32 1, %s471_s11  }
   0xe   : > { %p548_p10 = por %p88_p7, %p32_p0  ;;  %p552_p11 = por %p94_p8, %p38_p3 }
   0xf   : > { %s326_s24 = sshll.u32 %s475_s12, 8  ;;  %s313_s25 = sshll.u32 %s114_s23, 4 }
  0x10   : > { %s669_s21 = scalar_select %p548_p10, 1, 0 }
  0x11   : > { %s670_s22 = scalar_select %p552_p11, 1, 0 }
  0x12   : > { %s561_s28 = scalar_lea.hbm %s663_s0, %s326_s24  ;;  %s118_s29 = scalar_lea.vmem [#allocation3], %s313_s25 }
  0x13   : > { %s125_s30 = sshll.u32 %s118_s29, 4  ;;  %p565_p12 = pnand %p340_p9, %p538_p5  ;;  %s569_s30 = int_to_ptr.vmem [resolvable:$true] %s125_s30 }
  0x14   : > { %s571_s4 = scalar_lea.sflag [#allocation4], %s114_s23  ;;  %s379_s5 = scalar_lea.hbm %s561_s28, 256 }
  0x15   : > { %p380_p13 = scmp.ne.s32.totalorder %s561_s28, %s379_s5  ;;  %p381_p0 = pneg %p565_p12 }
  0x16   : > { %s384_s8 = scalar_lea.hbm %s663_s0, 1024  ;;  %p385_p3 = scmp.lt.u32.totalorder %s561_s28, %s663_s0 }
  0x17   : > { %p382_p1 = pnand %p381_p0, %p380_p13  ;;  %p386_p4 = scmp.lt.u32.totalorder %s384_s8, %s379_s5 }
  0x18   : > { %p388_p7 = scmp.lt.u32.totalorder %s379_s5, %s561_s28 }
  0x19   : > { %p383_p2 = pneg %p382_p1  ;;  %p387_p5 = por %p386_p4, %p385_p3 }
  0x1b   : > { %p389_p8 = por %p388_p7, %p387_p5 }
  0x1d   : > { %p390_p9 = pnand %p389_p8, %p383_p2 }
  0x1f   : > { %393 = shalt.err (!%p390_p9)
}
  0x20   : > { %s394_s17 = scalar_lea.vmem %s569_s30, 256  ;;  %s477_s19 = smov [#allocation3]  }
  0x21   : > { %p395_p13 = scmp.ne.s32.totalorder %s569_s30, %s394_s17  ;;  %s399_s23 = sshll.u32 %s477_s19, 4  ;;  %s400_s23 = int_to_ptr.vmem [resolvable:$false] %s399_s23 }
  0x22   : > { %s401_s24 = scalar_lea.vmem %s400_s23, 512  ;;  %p402_p10 = scmp.lt.s32.totalorder %s569_s30, %s400_s23 }
  0x23   : > { %p397_p1 = pnand %p395_p13, %p381_p0  ;;  %p403_p3 = scmp.lt.s32.totalorder %s401_s24, %s394_s17 }
  0x25   : > { %p398_p11 = pneg %p397_p1  ;;  %p404_p4 = por %p403_p3, %p402_p10 }
  0x27   : > { %p405_p5 = pnand %p404_p4, %p398_p11 }
  0x29   : > { %408 = shalt.err (!%p405_p5)
}
  0x2a   : > { %s478_s25 = smov 128   ;;  %s479_s26 = smov 8  }
  0x2b   : > { %335 = dma.hbm_to_vmem [thread:$0]  (!%p565_p12), %s561_s28, 256, %s569_s30, %s571_s4, %s478_s25, %s478_s25, %s479_s26  }
  0x2c   : > { %p316_p0 = scmp.ge.s32.totalorder %s475_s12, 1  ;;  %p142_p2 = scmp.lt.s32.totalorder %s475_s12, 5 }
  0x2e   : > { %p143_p7 = pnand %p316_p0, %p142_p2 }
  0x2f   : > { %s602_s27 = sand.u32 (!%p143_p7), 1, %s467_s10  }
  0x30   : > { %146 = sbr.rel (%p143_p7) target bundleno = 207 (0xcf), region = 28  ;;  %s317_s29 = sshll.u32 (!%p143_p7), %s602_s27, 4 }
  0x31   : > { %s149_s5 = scalar_lea.sflag (!%p143_p7), [#allocation4], %s602_s27  ;;  %s152_s6 = scalar_lea.vmem (!%p143_p7), [#allocation3], %s317_s29 }
  0x37   : > { %454 = dma.done.wait (%p542_p6), %s149_s5, 256  }
  0x38   : > { %456 = vsyncadd (%p542_p6), %s149_s5, 4294967040  ;;  %s319_s28 = sshll.u32 %s520_s13, 1  ;;  %vm188_vm0 = vcmask 261120   ;;  %s480_s8 = smov 32   ;;  %vm199_vm1 = vcmask 523520   ;;  %v202_v4 = vld [vmem:[%s152_s6] sm:$0xff] }
  0x39   : > { %p180_p10 = scmp.lt.s32.totalorder %s319_s28, 7  ;;  %vm208_vm2 = vcmask 523264   ;;  %s327_s20 = sshll.u32 %s520_s13, 8  ;;  %v203_v7 = vld [vmem:[%s152_s6 + $0x8] sm:$0xff] }
  0x3a   : > { %s177_s14 = scalar_lea.vmem [#allocation6], %s317_s29  ;;  %s618_s23 = scalar_lea.hbm %s665_s2, %s327_s20 }
  0x3b   : > { %s679_s28 = smov (!%p180_p10, %s319_s28), 7  ;;  %s225_s16 = sshll.u32 %s177_s14, 4  ;;  %s620_s16 = int_to_ptr.vmem [resolvable:$true] %s225_s16 }
  0x3c   : > { %s320_s30 = sshll.u32 %s679_s28, 3  ;;  %s212_s24 = scalar_lea.sflag [#allocation5], %s602_s27 }
  0x3d   : > { %s183_s7 = scalar_lea.vmem %s664_s1, %s320_s30  ;;  %s409_s25 = scalar_lea.vmem %s620_s16, 256 }
  0x3e   : > { %v186_v0 = vld [vmem:[%s183_s7] sm:$0xff]  ;;  %v187_v1 = vld [vmem:[%s183_s7 + $0x8] sm:$0xff]  ;;  %p410_p6 = scmp.ne.s32.totalorder %s620_s16, %s409_s25  ;;  %p672_p11 = scmp.ne.s32.totalorder %s669_s21, 0 }
  0x3f   : > { %193 = vrot.lane.b32.xlu0 %v186_v0, %s480_s8  ;;  %189 = vst.msk [vmem:[#allocation2] sm:$0xff] %vm188_vm0, %v186_v0  ;;  %190 = vst.msk [vmem:[#allocation2 + $0x8] sm:$0xff] %vm188_vm0, %v187_v1  ;;  %s481_s13 = smov [#allocation6]  }
  0x40   : > { %p411_p12 = pnand %p410_p6, %p672_p11  ;;  %s413_s26 = sshll.u32 %s481_s13, 4  ;;  %s414_s26 = int_to_ptr.vmem [resolvable:$false] %s413_s26 }
  0x41   : > { %s415_s29 = scalar_lea.vmem %s414_s26, 512  ;;  %p416_p9 = scmp.lt.s32.totalorder %s620_s16, %s414_s26 }
  0x42   : > { %p412_p8 = pneg %p411_p12  ;;  %p417_p13 = scmp.lt.s32.totalorder %s415_s29, %s409_s25 }
  0x43   : > { %195 = vrot.lane.b32.xlu0 %v187_v1, %s480_s8 }
  0x44   : > { %p418_p1 = por %p417_p13, %p416_p9 }
  0x46   : > { %p419_p3 = pnand %p418_p1, %p412_p8 }
  0xb1   : > { %v194_v2 = vpop.permute.xlu0 %193 }
  0xb2   : > { %200 = vst.msk [vmem:[#allocation2] sm:$0xff] %vm199_vm1, %v194_v2 }
  0xb5   : > { %v196_v3 = vpop.permute.xlu0 %195 }
  0xb6   : > { %201 = vst.msk [vmem:[#allocation2 + $0x8] sm:$0xff] %vm199_vm1, %v196_v3 }
  0xb9   : > { %v204_v5 = vld [vmem:[#allocation2] sm:$0xff] }
  0xba   : > { %v206_v6 = vadd.f32 %v204_v5, %v202_v4 }
  0xbc   : > { %209 = vst.msk [vmem:[%s177_s14] sm:$0xff] %vm208_vm2, %v206_v6 }
  0xbd   : > { %v205_v8 = vld [vmem:[#allocation2 + $0x8] sm:$0xff] }
  0xbe   : > { %v207_v9 = vadd.f32 %v205_v8, %v203_v7 }
  0xc0   : > { %210 = vst.msk [vmem:[%s177_s14 + $0x8] sm:$0xff] %vm208_vm2, %v207_v9 }
  0xc1   : > { %422 = shalt.err (!%p419_p3)
}
  0xc2   : > { %s423_s5 = scalar_lea.hbm %s618_s23, 256  ;;  %s427_s30 = scalar_lea.hbm %s665_s2, 1024 }
  0xc3   : > { %p424_p4 = scmp.ne.s32.totalorder %s618_s23, %s423_s5  ;;  %p428_p2 = scmp.lt.u32.totalorder %s618_s23, %s665_s2 }
  0xc4   : > { %p429_p7 = scmp.lt.u32.totalorder %s427_s30, %s423_s5  ;;  %p431_p6 = scmp.lt.u32.totalorder %s423_s5, %s618_s23 }
  0xc5   : > { %p425_p5 = pnand %p424_p4, %p672_p11 }
  0xc6   : > { %p430_p10 = por %p429_p7, %p428_p2 }
  0xc7   : > { %p426_p0 = pneg %p425_p5 }
  0xc8   : > { %p432_p12 = por %p431_p6, %p430_p10 }
  0xca   : > { %p433_p8 = pnand %p432_p12, %p426_p0 }
  0xcc   : > { %436 = shalt.err (!%p433_p8)
}
  0xcd   : > { %s482_s7 = smov 128   ;;  %s483_s8 = smov 8  }
  0xce   : > { %330 = dma.vmem_to_hbm [thread:$0]  (%p672_p11), %s620_s16, 256, %s618_s23, %s212_s24, %s482_s7, %s482_s7, %s483_s8  }
  0xcf PF: > { %p341_p9 = scmp.ge.s32.totalorder %s475_s12, 2  ;;  %s240_s20 = sand.u32 1, %s463_s9  }
  0xd0   : > { %p673_p13 = scmp.ne.s32.totalorder %s670_s22, 0  ;;  %s241_s14 = scalar_lea.sflag [#allocation5], %s240_s20 }
  0xd2   : > { %p337_p1 = pnand %p341_p9, %p673_p13 }
  0xd4   : > { %458 = dma.done.wait (!%p337_p1), %s241_s14, 256  }
  0xd5   : > { %460 = vsyncadd (!%p337_p1), %s241_s14, 4294967040  ;;  %p15_p3 = scmp.ge.s32.totalorder %s524_s15, 6   ;;  %s674_s9 = smov %s467_s10 }
  0xd6   : > { %s675_s10 = smov %s471_s11  ;;  %s676_s11 = smov %s536_s18 }
  0xd7   : > { %s677_s12 = smov %s524_s15  ;;  %17 = sbr.rel (!%p15_p3) target bundleno = 5 (0x5), region = 76 }
  0xde   :  { %246 = vsyncpa [#allocation4], 1 }
  0xdf   :  { %248 = vsyncpa [#allocation4 + $0x1], 1 }
  0xe0   :  { %249 = vsyncpa [#allocation5], 1 }
  0xe1   :  { %251 = vsyncpa [#allocation5 + $0x1], 1 }

</bundles_post_ra>
